<compile_context>
chip_gen: v5e
topology: v5e:2x2
jax: 0.10.0
libtpu: 0.0.40
codegen_flags: <defaults>
</compile_context>

<pallas_src>
import jax
import jax.numpy as jnp
from jax.experimental import pallas as pl
from jax.experimental.pallas import tpu as pltpu

_LANES = 128
# Largest lane-dense tile: 128K batch elements/step ~= 1.5 MiB of f32 HBM
# traffic (x read + out write) per grid step -- past the ~0.35 us/step overhead
# even at v7x's ~3.2 TB/s.
_MAX_BLOCK_N = 128 * 1024
# For large problems keep at least this many grid steps so the "parallel" grid
# axis can shard across TensorCores (v7x has 2 TCs per chip).
_MIN_STEPS_LARGE = 4


def _round_up(n, m):
    return ((n + m - 1) // m) * m


def _choose_block_n(n):
    """Pick a lane-dense batch tile: big enough to amortize the fixed per-step
    overhead, small enough to keep a multi-step grid on large inputs."""
    n128 = _round_up(max(n, 1), _LANES)
    if n128 <= _MAX_BLOCK_N:
        # Small problem: a single step.  Splitting it would only multiply the
        # fixed ~0.35 us/step cost.
        return n128
    return min(_MAX_BLOCK_N,
               _round_up(pl.cdiv(n128, _MIN_STEPS_LARGE), _LANES))


def lr_kernel(w_ref, b_ref, x_ref, o_ref):
    """Fused Linear(IN, 1) + Sigmoid on one lane-dense, feature-major tile.

    w_ref: SMEM (IN,)   -- Linear weight (row 0 of the (1, IN) PyTorch weight)
    b_ref: SMEM (1,)    -- Linear bias
    x_ref: VMEM (IN, T) -- feature-major input tile (T batch elements on lanes)
    o_ref: VMEM (1, T)  -- sigmoid(w . x + b) for the same T batch elements
    """
    num_in = x_ref.shape[0]
    # VPU FMA chain with SMEM scalar operands; accumulate in f32 (the astype is
    # a no-op for f32 inputs, an upcast for bf16 inputs).
    y = x_ref[0:1, :].astype(jnp.float32) * w_ref[0]
    for k in range(1, num_in):          # static IN (= 2) -> fully unrolled
        y = y + x_ref[k:k + 1, :].astype(jnp.float32) * w_ref[k]
    y = y + b_ref[0]
    # sigmoid(y) = 0.5 * (tanh(y / 2) + 1): tanh rides the EUP slot, no divide.
    o_ref[...] = (0.5 * (jnp.tanh(0.5 * y) + 1.0)).astype(o_ref.dtype)


def lr_forward_feature_major(xt, w, b, *, block_n=None):
    """Preferred entry point (per perf review): activations kept feature-major.

    xt: (IN, N) feature-major activations (IN == 2).
    w:  (OUT, IN) with OUT == 1;  b: (OUT,).
    Returns (N, OUT), identical to nn.Linear(2, 1) + Sigmoid applied to xt.T.
    """
    num_in, n = xt.shape
    num_out, num_in_w = w.shape
    assert num_in_w == num_in and num_out == 1

    if block_n is None:
        block_n = _choose_block_n(n)
    assert block_n % _LANES == 0

    # No jnp.pad: the partial last block is masked by Pallas.
    grid = (pl.cdiv(n, block_n),)

    w_flat = w.reshape(-1).astype(jnp.float32)  # (IN,)  -> SMEM scalars
    b_flat = b.reshape(-1).astype(jnp.float32)  # (OUT,) -> SMEM scalar

    out2d = pl.pallas_call(
        lr_kernel,
        out_shape=jax.ShapeDtypeStruct((num_out, n), xt.dtype),
        grid=grid,
        in_specs=[
            pl.BlockSpec(memory_space=pltpu.MemorySpace.SMEM),   # weights
            pl.BlockSpec(memory_space=pltpu.MemorySpace.SMEM),   # bias
            pl.BlockSpec((num_in, block_n), lambda i: (0, i)),   # x tile (IN, T)
        ],
        out_specs=pl.BlockSpec((num_out, block_n), lambda i: (0, i)),
        compiler_params=pltpu.CompilerParams(
            dimension_semantics=("parallel",),
            vmem_limit_bytes=32 * 1024 * 1024,
        ),
    )(w_flat, b_flat, xt)

    # (1, N) -> (N, 1): pure row-major reshape (no transpose, no copy).
    return out2d.reshape(n, num_out)


def lr_forward(x, w, b, *, block_n=None):
    """Drop-in PyTorch-layout wrapper: x is (N, IN) as nn.Linear expects.

    The (N, 2) -> (2, N) relayout here is one extra HBM pass over x; per the
    perf review, callers that can keep activations feature-major should call
    lr_forward_feature_major directly and skip it.
    """
    n, num_in = x.shape
    assert num_in == w.shape[1]
    return lr_forward_feature_major(x.T, w, b, block_n=block_n)


if __name__ == "__main__":
    key = jax.random.PRNGKey(0)
    kw, kb, k1, k2, k3 = jax.random.split(key, 5)

    IN, OUT = 2, 1
    # PyTorch nn.Linear(2, 1)-style uniform(-1/sqrt(in), 1/sqrt(in)) init.
    bound = 1.0 / (IN ** 0.5)
    w = jax.random.uniform(kw, (OUT, IN), minval=-bound, maxval=bound,
                           dtype=jnp.float32)
    b = jax.random.uniform(kb, (OUT,), minval=-bound, maxval=bound,
                           dtype=jnp.float32)

    def ref_fn(x_nd):   # (N, IN) -> (N, 1); pure elementwise f32 reference
        logit = x_nd[:, 0] * w[0, 0] + x_nd[:, 1] * w[0, 1] + b[0]
        return jax.nn.sigmoid(logit)[:, None]

    # Case 1: preferred feature-major path, N not a multiple of 128
    # (exercises the masked partial block; no transpose, no pad).
    N1 = 1000
    xt1 = jax.random.normal(k1, (IN, N1), dtype=jnp.float32)
    out1 = jax.block_until_ready(lr_forward_feature_major(xt1, w, b))
    assert out1.shape == (N1, OUT)
    assert jnp.allclose(out1, ref_fn(xt1.T), atol=1e-5, rtol=1e-5)

    # Case 2: multi-step "parallel" grid with a partial last block
    # (block_n=256 -> 3 grid steps over N=700).
    N2 = 700
    xt2 = jax.random.normal(k2, (IN, N2), dtype=jnp.float32)
    out2 = jax.block_until_ready(lr_forward_feature_major(xt2, w, b, block_n=256))
    assert out2.shape == (N2, OUT)
    assert jnp.allclose(out2, ref_fn(xt2.T), atol=1e-5, rtol=1e-5)

    # Case 3: drop-in PyTorch layout ((N, 2) input) at a tiny batch.
    N3 = 8
    x3 = jax.random.normal(k3, (N3, IN), dtype=jnp.float32)
    out3 = jax.block_until_ready(lr_forward(x3, w, b))
    assert out3.shape == (N3, OUT)
    assert jnp.allclose(out3, ref_fn(x3), atol=1e-5, rtol=1e-5)

    # Case 4: bf16 activations/outputs (halves HBM bytes; kernel still
    # upcasts to f32 for the FMA chain and tanh).
    xt4 = xt1.astype(jnp.bfloat16)
    out4 = jax.block_until_ready(lr_forward_feature_major(xt4, w, b))
    assert out4.dtype == jnp.bfloat16
    assert jnp.allclose(out4.astype(jnp.float32), ref_fn(xt1.T), atol=2e-2)

    print("KERNEL_OK")
</pallas_src>

<mosaic_0001>
module attributes {stable_mosaic.version = 11 : i64} {
  func.func @lr_kernel(%arg0: i32, %arg1: memref<2xf32, #tpu.memory_space<smem>>, %arg2: memref<1xf32, #tpu.memory_space<smem>>, %arg3: memref<2x1024xf32, #tpu.memory_space<vmem>>, %arg4: memref<1x1024xf32, #tpu.memory_space<vmem>>) attributes {dimension_semantics = [#tpu.dimension_semantics<parallel>], iteration_bounds = array<i64: 1>, scalar_prefetch = 0 : i64, scratch_operands = 0 : i64, tpu.core_type = #tpu.core_type<tc>, window_params = [{transform_indices = @transform_0, window_bounds = array<i64: 2>}, {transform_indices = @transform_1, window_bounds = array<i64: 1>}, {transform_indices = @transform_2, window_bounds = array<i64: 2, 1024>}, {transform_indices = @transform_3, window_bounds = array<i64: 1, 1024>}]} {
    %c0 = arith.constant 0 : index
    %c0_0 = arith.constant 0 : index
    %0 = vector.load %arg3[%c0, %c0_0] : memref<2x1024xf32, #tpu.memory_space<vmem>>, vector<1x1024xf32>
    %c0_1 = arith.constant 0 : index
    %1 = memref.load %arg1[%c0_1] : memref<2xf32, #tpu.memory_space<smem>>
    %2 = vector.broadcast %1 : f32 to vector<1x1024xf32>
    %3 = arith.mulf %0, %2 : vector<1x1024xf32>
    %c1 = arith.constant 1 : index
    %c0_2 = arith.constant 0 : index
    %4 = vector.load %arg3[%c1, %c0_2] : memref<2x1024xf32, #tpu.memory_space<vmem>>, vector<1x1024xf32>
    %c1_3 = arith.constant 1 : index
    %5 = memref.load %arg1[%c1_3] : memref<2xf32, #tpu.memory_space<smem>>
    %6 = vector.broadcast %5 : f32 to vector<1x1024xf32>
    %7 = arith.mulf %4, %6 : vector<1x1024xf32>
    %8 = arith.addf %3, %7 : vector<1x1024xf32>
    %c0_4 = arith.constant 0 : index
    %9 = memref.load %arg2[%c0_4] : memref<1xf32, #tpu.memory_space<smem>>
    %10 = vector.broadcast %9 : f32 to vector<1x1024xf32>
    %11 = arith.addf %8, %10 : vector<1x1024xf32>
    %cst = arith.constant 5.000000e-01 : f32
    %12 = vector.broadcast %cst : f32 to vector<1x1024xf32>
    %13 = arith.mulf %12, %11 : vector<1x1024xf32>
    %14 = math.tanh %13 : vector<1x1024xf32>
    %cst_5 = arith.constant 1.000000e+00 : f32
    %15 = vector.broadcast %cst_5 : f32 to vector<1x1024xf32>
    %16 = arith.addf %14, %15 : vector<1x1024xf32>
    %cst_6 = arith.constant 5.000000e-01 : f32
    %17 = vector.broadcast %cst_6 : f32 to vector<1x1024xf32>
    %18 = arith.mulf %17, %16 : vector<1x1024xf32>
    %c0_7 = arith.constant 0 : index
    %c0_8 = arith.constant 0 : index
    %19 = vector.load %arg4[%c0_7, %c0_8] : memref<1x1024xf32, #tpu.memory_space<vmem>>, vector<1x1024xf32>
    tpu.vector_store %arg4[%c0_7, %c0_8], %18 {strides = array<i32>} : memref<1x1024xf32, #tpu.memory_space<vmem>>, vector<1x1024xf32>,
    return
  }
  func.func @transform_0(%arg0: i32) -> i32 {
    %c0_i32 = arith.constant 0 : i32
    %c0_i32_0 = arith.constant 0 : i32
    return %c0_i32 : i32
  }
  func.func @transform_1(%arg0: i32) -> i32 {
    %c0_i32 = arith.constant 0 : i32
    %c0_i32_0 = arith.constant 0 : i32
    return %c0_i32 : i32
  }
  func.func @transform_2(%arg0: i32) -> (i32, i32) {
    %c0_i32 = arith.constant 0 : i32
    %c0_i32_0 = arith.constant 0 : i32
    return %c0_i32, %arg0 : i32, i32
  }
  func.func @transform_3(%arg0: i32) -> (i32, i32) {
    %c0_i32 = arith.constant 0 : i32
    %c0_i32_0 = arith.constant 0 : i32
    return %c0_i32, %arg0 : i32, i32
  }
}

</mosaic_0001>

<bundles_post_ra>
// kernel: tpu_custom_call.1
= control target key start
LH: loop header
LB: loop body
LE: loop exit
PB: predicated region body
PF: predicated region fallthrough
CT: control target
= control target key end

     0   :  { %9 = vsyncpa [#allocation6], 0  ;;  %s186_s0 = inlined_call_operand.vmem [shape: f32[2], index: 0, kind: input, shape index: {}]   ;;  %s187_s1 = inlined_call_operand.<no memory space> [shape: f32[1], index: 1, kind: input, shape index: {}]   ;;  %s188_s2 = inlined_call_operand.hbm [shape: f32[2,1000], index: 2, kind: input, shape index: {}]   ;;  %s189_s3 = inlined_call_operand.hbm [shape: f32[1,1000], index: 3, kind: output, shape index: {}]  }
   0x1   :  { %10 = vsyncpa [#allocation4], 0 }
   0x2   :  { %11 = vsyncpa [#allocation5], 0  ;;  %s17_s14 = sshll.u32 %s186_s0, 4  ;;  %s28_s17 = sshll.u32 %s188_s2, 4  ;;  %s18_s14 = int_to_ptr.vmem [resolvable:$true] %s17_s14  ;;  %s29_s17 = int_to_ptr.hbm [resolvable:$true] %s28_s17 }
   0x3   :  { %s151_s18 = smov [#allocation3]   ;;  %s152_s19 = smov [#allocation7]  }
   0x4   :  { %20 = dma.vmem_to_smem %s18_s14, 16, %s151_s18, [#allocation6]  }
   0x5   :  { %s30_s20 = sshll.u32 %s152_s19, 4  ;;  %s31_s20 = int_to_ptr.vmem [resolvable:$true] %s30_s20 }
   0x6   :  { %33 = dma.hbm_to_vmem [thread:$0]  %s29_s17, 256, %s31_s20, [#allocation4]  }
   0x7   :  { %145 = dma.done.wait [#allocation6], 16  }
   0x8   :  { %146 = vsyncadd [#allocation6], 4294967280 }
   0x9   :  { %147 = dma.done.wait [#allocation4], 256  }
   0xa   :  { %148 = vsyncadd [#allocation4], 4294967040 }
   0xb   :  { %42 = sfence }
   0xc   :  { %s44_s21 = sld [smem:[#allocation3]]  ;;  %v43_v0 = vld [vmem:[#allocation7] ss:$2 sm:$0xff]  ;;  %v48_v1 = vld [vmem:[#allocation7 + $0x1] ss:$2 sm:$0xff]  ;;  %v54_v6 = vstv %s187_s1  ;;  %s153_s23 = smov [#allocation8]  }
   0xd   :  { %s79_s22 = sld [smem:[#allocation3 + $0x1]]  ;;  %s66_s24 = sshll.u32 %s153_s23, 4  ;;  %s67_s24 = int_to_ptr.vmem [resolvable:$true] %s66_s24 }
   0xe   :  { %s68_s27 = sshll.u32 %s189_s3, 4  ;;  %s69_s27 = int_to_ptr.hbm [resolvable:$true] %s68_s27 }
  0x12   :  { %v45_v2 = vstv %s44_s21 }
  0x13   :  { %v46_v3 = vmul.f32 %v45_v2, %v43_v0  ;;  %v50_v4 = vstv %s79_s22 }
  0x14   :  { %v51_v5 = vmul.f32 %v50_v4, %v48_v1 }
  0x16   :  { %v52_v7 = vadd.f32 %v51_v5, %v46_v3 }
  0x18   :  { %v55_v8 = vadd.f32 %v54_v6, %v52_v7 }
  0x1a   :  { %v56_v9 = vmul.f32 0.5, %v55_v8 }
  0x1c   :  { %83 = vtanh.f32 %v56_v9 }
  0x22   :  { %v84_v10 = vpop.eup %83 }
  0x23   :  { %v58_v11 = vadd.f32 1.0, %v84_v10 }
  0x25   :  { %v59_v12 = vmul.f32 0.5, %v58_v11 }
  0x27   :  { %60 = vst [vmem:[#allocation8] sm:$0xff] %v59_v12 }
  0x28   :  { %71 = dma.vmem_to_hbm [thread:$0]  %s67_s24, 128, %s69_s27, [#allocation5]  }
  0x29   :  { %149 = dma.done.wait [#allocation5], 128  }
  0x2a   :  { %150 = vsyncadd [#allocation5], 4294967168 }
  0x2b   :  { %76 = vsyncpa [#allocation4], 1 }
  0x2c   :  { %77 = vsyncpa [#allocation5], 1 }
  0x2d   :  { %78 = vsyncpa [#allocation6], 1 }

</bundles_post_ra>
